<compile_context>
chip_gen: v7x
topology: tpu7x:2x2x1
jax: 0.10.0
libtpu: 0.0.40
codegen_flags: <defaults>
</compile_context>

<pallas_src>
import math
import functools

import jax
import jax.numpy as jnp
import numpy as np
from jax.experimental import pallas as pl
from jax.experimental.pallas import tpu as pltpu


def _cross_attn_kernel(qt_ref, kvt_ref, mask_ref,
                       wq_ref, bq_ref, wkv_ref, bkv_ref, wo_ref, bo_ref,
                       o_ref, *, n_heads, head_dim):
    H, hd = n_heads, head_dim
    D = H * hd
    BL = qt_ref.shape[1]        # B*L  (tokens, queries)
    BS = kvt_ref.shape[1]       # B*S  (tokens, patches)

    qt = qt_ref[...]            # (D,  B*L) f32, feature-major
    kvt = kvt_ref[...]          # (D,  B*S) f32, feature-major

    # ---- wide in-projections (scale already folded into wq/bq by the wrapper) ----
    #   Q^T  = Wq^T  @ q^T    : one (D,D)x(D,BL) matmul
    #   KV^T = Wkv^T @ kv^T   : one fused (2D,D)x(D,BS) matmul (K rows then V rows)
    Qt = jnp.dot(wq_ref[...], qt, preferred_element_type=jnp.float32) + bq_ref[...]      # (D, BL)
    KVt = jnp.dot(wkv_ref[...], kvt, preferred_element_type=jnp.float32) + bkv_ref[...]  # (2D, BS)

    # Head split: in this orientation it is a sublane-aligned reshape (free).
    Qh = jnp.transpose(Qt.reshape(H, hd, BL), (0, 2, 1))    # (H, BL, hd)
    Kt = KVt[:D, :].reshape(H, hd, BS)                      # (H, hd, BS)
    Vt = KVt[D:, :].reshape(H, hd, BS)                      # (H, hd, BS)

    # ---- scores over the (B*L, B*S) token grid, head-batched ----
    scores = jnp.einsum('hlk,hks->hls', Qh, Kt,
                        preferred_element_type=jnp.float32)                               # (H, BL, BS)
    # Additive mask precomputed in the wrapper: 0 where allowed, -1e30 where the
    # patch is in the future OR belongs to another batch element.  Column s=0 of
    # the own batch is always allowed (cumsum >= 0), so no row is fully masked.
    scores = scores + mask_ref[...][None, :, :]

    # ---- softmax (exact normalization) ----
    m = jnp.max(scores, axis=-1, keepdims=True)
    e = jnp.exp(scores - m)
    p = e / jnp.sum(e, axis=-1, keepdims=True)                                            # (H, BL, BS)

    # ---- weighted values: contract the shared token dim (no V transpose needed) ----
    O = jnp.einsum('hls,hks->hlk', p, Vt, preferred_element_type=jnp.float32)             # (H, BL, hd)

    # ---- out-projection folded per head; reduce over heads (no concatenate) ----
    outs = jnp.einsum('hlk,hkd->hld', O, wo_ref[...],
                      preferred_element_type=jnp.float32)                                 # (H, BL, D)
    out = jnp.sum(outs, axis=0) + bo_ref[...]                                             # (BL, D)

    o_ref[...] = out.astype(o_ref.dtype)


def cross_attention(queries, patches, patch_boundaries, params, *, n_heads):
    """queries (B,L,D) f32, patches (B,S,D) f32, patch_boundaries (B,L) int."""
    B, L, D = queries.shape
    S = patches.shape[1]
    H = n_heads
    hd = D // H
    BL, BS = B * L, B * S

    wq_t, wk_t, wv_t, wo_t, bq, bk, bv, bo = params
    scale = 1.0 / math.sqrt(hd)

    # --- additive mask, int32 cumsum (no f32 index comparison), built once in XLA ---
    pidx = jnp.cumsum(patch_boundaries.astype(jnp.int32), axis=1)          # (B, L)
    within = jnp.arange(S, dtype=jnp.int32)[None, None, :] <= pidx[:, :, None]   # (B, L, S)
    b_idx = jnp.arange(B, dtype=jnp.int32)
    same_b = b_idx[:, None, None, None] == b_idx[None, None, :, None]      # (B, 1, B, 1)
    allow = same_b & within[:, :, None, :]                                 # (B, L, B, S)
    mask2 = jnp.where(allow, jnp.float32(0.0), jnp.float32(-1e30)).reshape(BL, BS)

    # --- weight prep (done once per call): scale folded into Q, K|V fused,
    #     everything transposed for the feature-major in-projections ---
    wq_f = (wq_t * scale).T.astype(jnp.float32)                   # (D, D)
    bq_f = (bq * scale).reshape(D, 1).astype(jnp.float32)         # (D, 1)
    wkv_f = jnp.concatenate([wk_t, wv_t], axis=1).T.astype(jnp.float32)   # (2D, D)
    bkv_f = jnp.concatenate([bk, bv]).reshape(2 * D, 1).astype(jnp.float32)
    wo_h = wo_t.reshape(H, hd, D).astype(jnp.float32)             # (H, hd, D)
    bo2 = bo.reshape(1, D).astype(jnp.float32)

    # --- activations flattened over batch and transposed to feature-major ---
    qT = queries.reshape(BL, D).T                                  # (D, BL)
    kvT = patches.reshape(BS, D).T                                 # (D, BS)

    kernel = functools.partial(_cross_attn_kernel, n_heads=H, head_dim=hd)

    # Single grid step: whole problem fits trivially in VMEM.
    # TODO(synk): for large L/S add a KV-tile grid axis with flash-style online
    # softmax before the (H, B*L, B*S) scores tensor approaches v7x's 64 MiB VMEM.
    out = pl.pallas_call(
        kernel,
        out_shape=jax.ShapeDtypeStruct((BL, D), queries.dtype),
        grid=(1,),
        in_specs=[
            pl.BlockSpec((D, BL), lambda i: (0, 0)),        # q^T
            pl.BlockSpec((D, BS), lambda i: (0, 0)),        # kv^T
            pl.BlockSpec((BL, BS), lambda i: (0, 0)),       # additive mask
            pl.BlockSpec((D, D), lambda i: (0, 0)),         # Wq^T (scaled)
            pl.BlockSpec((D, 1), lambda i: (0, 0)),         # bq (scaled)
            pl.BlockSpec((2 * D, D), lambda i: (0, 0)),     # [Wk|Wv]^T fused
            pl.BlockSpec((2 * D, 1), lambda i: (0, 0)),     # [bk|bv]
            pl.BlockSpec((H, hd, D), lambda i: (0, 0, 0)),  # Wo per head
            pl.BlockSpec((1, D), lambda i: (0, 0)),         # bo
        ],
        out_specs=pl.BlockSpec((BL, D), lambda i: (0, 0)),
        compiler_params=pltpu.CompilerParams(
            dimension_semantics=("arbitrary",),
        ),
    )(qT, kvT, mask2, wq_f, bq_f, wkv_f, bkv_f, wo_h, bo2)

    return out.reshape(B, L, D)


def _reference(queries, patches, patch_boundaries, params, *, n_heads):
    """Pure-JAX reference matching torch.nn.MultiheadAttention (eval mode)."""
    wq_t, wk_t, wv_t, wo_t, bq, bk, bv, bo = params
    B, L, D = queries.shape
    S = patches.shape[1]
    hd = D // n_heads

    with jax.default_matmul_precision("highest"):
        pidx = jnp.cumsum(patch_boundaries.astype(jnp.int32), axis=1)          # (B, L)
        mask = jnp.arange(S)[None, None, :] > pidx[:, :, None]                 # (B, L, S)

        Q = queries @ wq_t + bq
        K = patches @ wk_t + bk
        V = patches @ wv_t + bv
        Q = Q.reshape(B, L, n_heads, hd).transpose(0, 2, 1, 3) / math.sqrt(hd)
        K = K.reshape(B, S, n_heads, hd).transpose(0, 2, 1, 3)
        V = V.reshape(B, S, n_heads, hd).transpose(0, 2, 1, 3)
        scores = jnp.einsum("bhld,bhsd->bhls", Q, K)
        scores = jnp.where(mask[:, None, :, :], -jnp.inf, scores)
        p = jax.nn.softmax(scores, axis=-1)
        O = jnp.einsum("bhls,bhsd->bhld", p, V).transpose(0, 2, 1, 3).reshape(B, L, D)
        return O @ wo_t + bo


if __name__ == "__main__":
    B, L, S, D, H = 2, 16, 8, 32, 4

    key = jax.random.PRNGKey(0)
    ks = jax.random.split(key, 8)
    queries = jax.random.normal(ks[0], (B, L, D), jnp.float32)
    patches = jax.random.normal(ks[1], (B, S, D), jnp.float32)
    patch_boundaries = jax.random.bernoulli(ks[2], 0.3, (B, L)).astype(jnp.int32)

    # Deterministic synthetic MHA parameters (stored pre-transposed: x @ W^T form).
    scale = 1.0 / math.sqrt(D)
    wq_t = jax.random.normal(ks[3], (D, D), jnp.float32) * scale
    wk_t = jax.random.normal(ks[4], (D, D), jnp.float32) * scale
    wv_t = jax.random.normal(ks[5], (D, D), jnp.float32) * scale
    wo_t = jax.random.normal(ks[6], (D, D), jnp.float32) * scale
    bq, bk, bv, bo = (jax.random.normal(k, (D,), jnp.float32) * 0.01
                      for k in jax.random.split(ks[7], 4))
    params = (wq_t, wk_t, wv_t, wo_t, bq, bk, bv, bo)

    # TODO(synk): nn.Dropout inside MultiheadAttention is a no-op at inference; not modeled.
    out = cross_attention(queries, patches, patch_boundaries, params, n_heads=H)
    jax.block_until_ready(out)

    ref = _reference(queries, patches, patch_boundaries, params, n_heads=H)
    np.testing.assert_allclose(np.asarray(out), np.asarray(ref), rtol=1e-5, atol=1e-5)

    print("KERNEL_OK")
</pallas_src>

<mosaic_0001>
module attributes {stable_mosaic.version = 11 : i64} {
  func.func @_cross_attn_kernel(%arg0: i32, %arg1: memref<32x32xf32, #tpu.memory_space<vmem>>, %arg2: memref<32x16xf32, #tpu.memory_space<vmem>>, %arg3: memref<32x16xf32, #tpu.memory_space<vmem>>, %arg4: memref<32x32xf32, #tpu.memory_space<vmem>>, %arg5: memref<32x1xf32, #tpu.memory_space<vmem>>, %arg6: memref<64x32xf32, #tpu.memory_space<vmem>>, %arg7: memref<64x1xf32, #tpu.memory_space<vmem>>, %arg8: memref<4x8x32xf32, #tpu.memory_space<vmem>>, %arg9: memref<1x32xf32, #tpu.memory_space<vmem>>, %arg10: memref<32x32xf32, #tpu.memory_space<vmem>>) attributes {dimension_semantics = [#tpu.dimension_semantics<arbitrary>], iteration_bounds = array<i64: 1>, scalar_prefetch = 0 : i64, scratch_operands = 0 : i64, tpu.core_type = #tpu.core_type<tc>, window_params = [{pipeline_mode = #tpu.pipeline_mode<synchronous>, transform_indices = @transform_0, window_bounds = array<i64: 32, 32>}, {pipeline_mode = #tpu.pipeline_mode<synchronous>, transform_indices = @transform_1, window_bounds = array<i64: 32, 16>}, {pipeline_mode = #tpu.pipeline_mode<synchronous>, transform_indices = @transform_2, window_bounds = array<i64: 32, 16>}, {pipeline_mode = #tpu.pipeline_mode<synchronous>, transform_indices = @transform_3, window_bounds = array<i64: 32, 32>}, {pipeline_mode = #tpu.pipeline_mode<synchronous>, transform_indices = @transform_4, window_bounds = array<i64: 32, 1>}, {pipeline_mode = #tpu.pipeline_mode<synchronous>, transform_indices = @transform_5, window_bounds = array<i64: 64, 32>}, {pipeline_mode = #tpu.pipeline_mode<synchronous>, transform_indices = @transform_6, window_bounds = array<i64: 64, 1>}, {pipeline_mode = #tpu.pipeline_mode<synchronous>, transform_indices = @transform_7, window_bounds = array<i64: 4, 8, 32>}, {pipeline_mode = #tpu.pipeline_mode<synchronous>, transform_indices = @transform_8, window_bounds = array<i64: 1, 32>}, {pipeline_mode = #tpu.pipeline_mode<synchronous>, transform_indices = @transform_9, window_bounds = array<i64: 32, 32>}]} {
    %c0 = arith.constant 0 : index
    %c0_0 = arith.constant 0 : index
    %0 = vector.load %arg1[%c0, %c0_0] : memref<32x32xf32, #tpu.memory_space<vmem>>, vector<32x32xf32>
    %c0_1 = arith.constant 0 : index
    %c0_2 = arith.constant 0 : index
    %1 = vector.load %arg2[%c0_1, %c0_2] : memref<32x16xf32, #tpu.memory_space<vmem>>, vector<32x16xf32>
    %c0_3 = arith.constant 0 : index
    %c0_4 = arith.constant 0 : index
    %2 = vector.load %arg4[%c0_3, %c0_4] : memref<32x32xf32, #tpu.memory_space<vmem>>, vector<32x32xf32>
    %cst = arith.constant dense<0.000000e+00> : vector<32x32xf32>
    %3 = tpu.matmul %2, %0, %cst {dimension_numbers = #tpu.dot_dimension_numbers<[1], [0], [0], [1], [0, 0, 1, 1], [], []>} : vector<32x32xf32>, vector<32x32xf32>, vector<32x32xf32> -> vector<32x32xf32>
    %c0_5 = arith.constant 0 : index
    %c0_6 = arith.constant 0 : index
    %4 = vector.load %arg5[%c0_5, %c0_6] : memref<32x1xf32, #tpu.memory_space<vmem>>, vector<32x1xf32>
    %5 = vector.broadcast %4 : vector<32x1xf32> to vector<32x32xf32>
    %6 = arith.addf %3, %5 : vector<32x32xf32>
    %c0_7 = arith.constant 0 : index
    %c0_8 = arith.constant 0 : index
    %7 = vector.load %arg6[%c0_7, %c0_8] : memref<64x32xf32, #tpu.memory_space<vmem>>, vector<64x32xf32>
    %cst_9 = arith.constant dense<0.000000e+00> : vector<64x16xf32>
    %8 = tpu.matmul %7, %1, %cst_9 {dimension_numbers = #tpu.dot_dimension_numbers<[1], [0], [0], [1], [0, 0, 1, 1], [], []>} : vector<64x32xf32>, vector<32x16xf32>, vector<64x16xf32> -> vector<64x16xf32>
    %c0_10 = arith.constant 0 : index
    %c0_11 = arith.constant 0 : index
    %9 = vector.load %arg7[%c0_10, %c0_11] : memref<64x1xf32, #tpu.memory_space<vmem>>, vector<64x1xf32>
    %10 = vector.broadcast %9 : vector<64x1xf32> to vector<64x16xf32>
    %11 = arith.addf %8, %10 : vector<64x16xf32>
    %12 = vector.shape_cast %6 : vector<32x32xf32> to vector<4x8x32xf32>
    %13 = tpu.transpose %12, [0, 2, 1] : vector<4x8x32xf32> -> vector<4x32x8xf32>
    %14 = vector.extract_strided_slice %11 {offsets = [0, 0], sizes = [32, 16], strides = [1, 1]} : vector<64x16xf32> to vector<32x16xf32>
    %15 = vector.shape_cast %14 : vector<32x16xf32> to vector<4x8x16xf32>
    %16 = vector.extract_strided_slice %11 {offsets = [32, 0], sizes = [32, 16], strides = [1, 1]} : vector<64x16xf32> to vector<32x16xf32>
    %17 = vector.shape_cast %16 : vector<32x16xf32> to vector<4x8x16xf32>
    "tpu.trace_start"() <{level = 10 : i32, message = "hlk,hks->hls"}> : () -> ()
    %cst_12 = arith.constant dense<0.000000e+00> : vector<4x32x16xf32>
    %18 = tpu.matmul %13, %15, %cst_12 {dimension_numbers = #tpu.dot_dimension_numbers<[2], [1], [1], [2], [0, 0, 0, 1, 1, 2], [0], [0]>} : vector<4x32x8xf32>, vector<4x8x16xf32>, vector<4x32x16xf32> -> vector<4x32x16xf32>
    "tpu.trace_stop"() : () -> ()
    %c0_13 = arith.constant 0 : index
    %c0_14 = arith.constant 0 : index
    %19 = vector.load %arg3[%c0_13, %c0_14] : memref<32x16xf32, #tpu.memory_space<vmem>>, vector<32x16xf32>
    %20 = vector.shape_cast %19 : vector<32x16xf32> to vector<1x32x16xf32>
    %21 = vector.broadcast %20 : vector<1x32x16xf32> to vector<4x32x16xf32>
    %22 = arith.addf %18, %21 : vector<4x32x16xf32>
    %cst_15 = arith.constant dense<0xFF800000> : vector<4x32xf32>
    %23 = vector.multi_reduction <maximumf>, %22, %cst_15 [2] : vector<4x32x16xf32> to vector<4x32xf32>
    %24 = vector.shape_cast %23 : vector<4x32xf32> to vector<4x32x1xf32>
    %25 = vector.broadcast %24 : vector<4x32x1xf32> to vector<4x32x16xf32>
    %26 = arith.subf %22, %25 : vector<4x32x16xf32>
    %27 = math.exp %26 : vector<4x32x16xf32>
    %cst_16 = arith.constant dense<0.000000e+00> : vector<4x32xf32>
    %28 = vector.multi_reduction <add>, %27, %cst_16 [2] : vector<4x32x16xf32> to vector<4x32xf32>
    %29 = vector.shape_cast %28 : vector<4x32xf32> to vector<4x32x1xf32>
    %30 = vector.broadcast %29 : vector<4x32x1xf32> to vector<4x32x16xf32>
    %31 = arith.divf %27, %30 : vector<4x32x16xf32>
    "tpu.trace_start"() <{level = 10 : i32, message = "hls,hks->hlk"}> : () -> ()
    %cst_17 = arith.constant dense<0.000000e+00> : vector<4x32x8xf32>
    %32 = tpu.matmul %31, %17, %cst_17 {dimension_numbers = #tpu.dot_dimension_numbers<[2], [2], [1], [1], [0, 0, 0, 1, 1, 1], [0], [0]>} : vector<4x32x16xf32>, vector<4x8x16xf32>, vector<4x32x8xf32> -> vector<4x32x8xf32>
    "tpu.trace_stop"() : () -> ()
    %c0_18 = arith.constant 0 : index
    %c0_19 = arith.constant 0 : index
    %c0_20 = arith.constant 0 : index
    %33 = vector.load %arg8[%c0_18, %c0_19, %c0_20] : memref<4x8x32xf32, #tpu.memory_space<vmem>>, vector<4x8x32xf32>
    "tpu.trace_start"() <{level = 10 : i32, message = "hlk,hkd->hld"}> : () -> ()
    %cst_21 = arith.constant dense<0.000000e+00> : vector<4x32x32xf32>
    %34 = tpu.matmul %32, %33, %cst_21 {dimension_numbers = #tpu.dot_dimension_numbers<[2], [1], [1], [2], [0, 0, 0, 1, 1, 2], [0], [0]>} : vector<4x32x8xf32>, vector<4x8x32xf32>, vector<4x32x32xf32> -> vector<4x32x32xf32>
    "tpu.trace_stop"() : () -> ()
    %cst_22 = arith.constant dense<0.000000e+00> : vector<32x32xf32>
    %35 = vector.multi_reduction <add>, %34, %cst_22 [0] : vector<4x32x32xf32> to vector<32x32xf32>
    %c0_23 = arith.constant 0 : index
    %c0_24 = arith.constant 0 : index
    %36 = vector.load %arg9[%c0_23, %c0_24] : memref<1x32xf32, #tpu.memory_space<vmem>>, vector<1x32xf32>
    %37 = vector.broadcast %36 : vector<1x32xf32> to vector<32x32xf32>
    %38 = arith.addf %35, %37 : vector<32x32xf32>
    %c0_25 = arith.constant 0 : index
    %c0_26 = arith.constant 0 : index
    %39 = vector.load %arg10[%c0_25, %c0_26] : memref<32x32xf32, #tpu.memory_space<vmem>>, vector<32x32xf32>
    tpu.vector_store %arg10[%c0_25, %c0_26], %38 {strides = array<i32>} : memref<32x32xf32, #tpu.memory_space<vmem>>, vector<32x32xf32>,
    return
  }
  func.func @transform_0(%arg0: i32) -> (i32, i32) {
    %c0_i32 = arith.constant 0 : i32
    %c0_i32_0 = arith.constant 0 : i32
    %c0_i32_1 = arith.constant 0 : i32
    return %c0_i32, %c0_i32_0 : i32, i32
  }
  func.func @transform_1(%arg0: i32) -> (i32, i32) {
    %c0_i32 = arith.constant 0 : i32
    %c0_i32_0 = arith.constant 0 : i32
    %c0_i32_1 = arith.constant 0 : i32
    return %c0_i32, %c0_i32_0 : i32, i32
  }
  func.func @transform_2(%arg0: i32) -> (i32, i32) {
    %c0_i32 = arith.constant 0 : i32
    %c0_i32_0 = arith.constant 0 : i32
    %c0_i32_1 = arith.constant 0 : i32
    return %c0_i32, %c0_i32_0 : i32, i32
  }
  func.func @transform_3(%arg0: i32) -> (i32, i32) {
    %c0_i32 = arith.constant 0 : i32
    %c0_i32_0 = arith.constant 0 : i32
    %c0_i32_1 = arith.constant 0 : i32
    return %c0_i32, %c0_i32_0 : i32, i32
  }
  func.func @transform_4(%arg0: i32) -> (i32, i32) {
    %c0_i32 = arith.constant 0 : i32
    %c0_i32_0 = arith.constant 0 : i32
    %c0_i32_1 = arith.constant 0 : i32
    return %c0_i32, %c0_i32_0 : i32, i32
  }
  func.func @transform_5(%arg0: i32) -> (i32, i32) {
    %c0_i32 = arith.constant 0 : i32
    %c0_i32_0 = arith.constant 0 : i32
    %c0_i32_1 = arith.constant 0 : i32
    return %c0_i32, %c0_i32_0 : i32, i32
  }
  func.func @transform_6(%arg0: i32) -> (i32, i32) {
    %c0_i32 = arith.constant 0 : i32
    %c0_i32_0 = arith.constant 0 : i32
    %c0_i32_1 = arith.constant 0 : i32
    return %c0_i32, %c0_i32_0 : i32, i32
  }
  func.func @transform_7(%arg0: i32) -> (i32, i32, i32) {
    %c0_i32 = arith.constant 0 : i32
    %c0_i32_0 = arith.constant 0 : i32
    %c0_i32_1 = arith.constant 0 : i32
    %c0_i32_2 = arith.constant 0 : i32
    return %c0_i32, %c0_i32_0, %c0_i32_1 : i32, i32, i32
  }
  func.func @transform_8(%arg0: i32) -> (i32, i32) {
    %c0_i32 = arith.constant 0 : i32
    %c0_i32_0 = arith.constant 0 : i32
    %c0_i32_1 = arith.constant 0 : i32
    return %c0_i32, %c0_i32_0 : i32, i32
  }
  func.func @transform_9(%arg0: i32) -> (i32, i32) {
    %c0_i32 = arith.constant 0 : i32
    %c0_i32_0 = arith.constant 0 : i32
    %c0_i32_1 = arith.constant 0 : i32
    return %c0_i32, %c0_i32_0 : i32, i32
  }
}

</mosaic_0001>

<bundles_post_ra>
// kernel: tpu_custom_call.1
= control target key start
LH: loop header
LB: loop body
LE: loop exit
PB: predicated region body
PF: predicated region fallthrough
CT: control target
= control target key end

     0   :  { %vm69_vm0 = vcmask 261120   ;;  %v2289_v7 = vmov 0   ;;  %s2738_s0 = inlined_call_operand.vmem [shape: f32[32,32], index: 0, kind: input, shape index: {}]   ;;  %s2739_s1 = inlined_call_operand.vmem [shape: f32[32,16], index: 1, kind: input, shape index: {}]   ;;  %s2740_s2 = inlined_call_operand.vmem [shape: f32[32,16], index: 2, kind: input, shape index: {}]   ;;  %s2741_s3 = inlined_call_operand.vmem [shape: f32[32,32], index: 3, kind: input, shape index: {}]   ;;  %s2742_s4 = inlined_call_operand.vmem [shape: f32[32,1], index: 4, kind: input, shape index: {}]   ;;  %s2743_s5 = inlined_call_operand.vmem [shape: f32[64,32], index: 5, kind: input, shape index: {}]   ;;  %s2744_s6 = inlined_call_operand.vmem [shape: f32[64,1], index: 6, kind: input, shape index: {}]   ;;  %s2745_s7 = inlined_call_operand.vmem [shape: f32[4,8,32], index: 7, kind: input, shape index: {}]   ;;  %s2746_s8 = inlined_call_operand.vmem [shape: f32[1,32], index: 8, kind: input, shape index: {}]   ;;  %s2747_s9 = inlined_call_operand.hbm [shape: f32[32,32], index: 9, kind: output, shape index: {}]  }
   0x1   :  { %v33_v0 = vld [vmem:[%s2738_s0] sm:$0xff]  ;;  %v34_v1 = vld [vmem:[%s2738_s0 + $0x8] sm:$0xff]  ;;  %v35_v5 = vld [vmem:[%s2738_s0 + $0x10] sm:$0xff]  ;;  %2199 = vset.pattern.permute.xlu0 %v2289_v7  ;;  %2200 = vset.pattern.permute.xlu1 %v2289_v7 }
   0x2   :  { %v37_v2 = vld [vmem:[%s2739_s1] sm:$0xff]  ;;  %v2176_v3 = vpack.c.bf16 %v34_v1, %v33_v0  ;;  %v38_v4 = vld [vmem:[%s2739_s1 + $0x8] sm:$0xff]  ;;  %v36_v6 = vld [vmem:[%s2738_s0 + $0x18] sm:$0xff] }
   0x3   :  { %v2184_v8 = vpack.c.bf16 %v38_v4, %v37_v2  ;;  %v2180_v9 = vpack.c.bf16 %v36_v6, %v35_v5  ;;  %v39_v10 = vld [vmem:[%s2739_s1 + $0x10] sm:$0xff]  ;;  %v40_v11 = vld [vmem:[%s2739_s1 + $0x18] sm:$0xff]  ;;  %v41_v12 = vld [vmem:[%s2741_s3] sm:$0xff] }
   0x4   :  { %2177 = vmatprep.subr.bf16.mxu0 %v2176_v3  ;;  %v2188_v13 = vpack.c.bf16 %v40_v11, %v39_v10  ;;  %2054 = vmatprep.mubr.msk.f32.mxu0 %vm69_vm0, %v41_v12  ;;  %v167_v14 = vld [vmem:[%s2743_s5] sm:$0xff]  ;;  %v47_v16 = vld [vmem:[%s2742_s4 + $0x10] sm:$0xff]  ;;  %v42_v17 = vld [vmem:[%s2741_s3 + $0x8] sm:$0xff] }
   0x5   :  { %2185 = vmatprep.subr.bf16.mxu1 %v2184_v8  ;;  %2179 = vmatpush3.bf16.msra.mxu0 %v2176_v3  ;;  %v45_v15 = vld [vmem:[%s2742_s4] sm:$0xff]  ;;  %v46_v18 = vld [vmem:[%s2742_s4 + $0x8] sm:$0xff] }
   0x6   :  { %2187 = vmatpush3.bf16.msra.mxu1 %v2184_v8  ;;  %2181 = vmatprep.subr.bf16.mxu0 %v2180_v9 }
   0x7   :  { %2189 = vmatprep.subr.bf16.mxu1 %v2188_v13  ;;  %2068 = vmatprep.mubr.msk.f32.mxu1 %vm69_vm0, %v167_v14 }
   0x8   :  { %51 = vperm.xlu0 %2199, %v45_v15   ;;  %61 = vperm.xlu1 %2200, %v47_v16  }
   0x9   :  { %2183 = vmatpush3.bf16.msra.mxu0 %v2180_v9 }
   0xa   :  { %14 = vsyncpa [#allocation3], 0  ;;  %2191 = vmatpush3.bf16.msra.mxu1 %v2188_v13  ;;  %v168_v19 = vld [vmem:[%s2743_s5 + $0x8] sm:$0xff]  ;;  %v43_v20 = vld [vmem:[%s2741_s3 + $0x10] sm:$0xff]  ;;  %vm484_vm1 = vcmask 64512   ;;  %vm873_vm2 = vcmask 130048  }
   0xb   :  { %v169_v21 = vld [vmem:[%s2743_s5 + $0x10] sm:$0xff]  ;;  %v48_v22 = vld [vmem:[%s2742_s4 + $0x18] sm:$0xff]  ;;  %v175_v24 = vld [vmem:[%s2744_s6] sm:$0xff] }
   0xc   :  { %2055 = vmatmul.mubr.msk.f32.vlgmr.msra.gmra.mrb[0].mxu0 %vm69_vm0, %v42_v17  ;;  %56 = vperm.xlu0 %2199, %v46_v18   ;;  %v44_v23 = vld [vmem:[%s2741_s3 + $0x18] sm:$0xff]  ;;  %v176_v26 = vld [vmem:[%s2744_s6 + $0x8] sm:$0xff]  ;;  %v177_v27 = vld [vmem:[%s2744_s6 + $0x10] sm:$0xff] }
   0xd   :  { %2069 = vmatmul.mubr.msk.f32.vlgmr.msra.gmra.mrb[0].mxu1 %vm69_vm0, %v168_v19  ;;  %2057 = vmatprep.mubr.msk.f32.mxu0 %vm69_vm0, %v43_v20  ;;  %v170_v25 = vld [vmem:[%s2743_s5 + $0x18] sm:$0xff]  ;;  %v171_v46 = vld [vmem:[%s2743_s5 + $0x20] sm:$0xff]  ;;  %v172_v50 = vld [vmem:[%s2743_s5 + $0x28] sm:$0xff] }
   0xe   :  { %2071 = vmatprep.mubr.msk.f32.mxu1 %vm69_vm0, %v169_v21  ;;  %66 = vperm.xlu1 %2200, %v48_v22   ;;  %v178_v28 = vld [vmem:[%s2744_s6 + $0x18] sm:$0xff]  ;;  %v173_v51 = vld [vmem:[%s2743_s5 + $0x30] sm:$0xff]  ;;  %v481_v13 = vld [vmem:[%s2740_s2 + $0x8] sm:$0xff] }
   0xf   :  { %v174_v53 = vld [vmem:[%s2743_s5 + $0x38] sm:$0xff]  ;;  %v480_v14 = vld [vmem:[%s2740_s2] sm:$0xff] }
  0x10   :  { %2058 = vmatmul.mubr.msk.f32.gmra.mrb[2].mxu0 %vm69_vm0, %v44_v23  ;;  %185 = vperm.xlu0 %2199, %v175_v24   ;;  %v483_v24 = vld [vmem:[%s2740_s2 + $0x18] sm:$0xff] }
  0x11   :  { %2072 = vmatmul.mubr.msk.f32.gmra.mrb[2].mxu1 %vm69_vm0, %v170_v25 }
  0x12   :  { %190 = vperm.xlu1 %2200, %v176_v26   ;;  %2074 = vmatprep.mubr.msk.f32.mxu1 %vm69_vm0, %v171_v46  ;;  %v482_v26 = vld [vmem:[%s2740_s2 + $0x10] sm:$0xff] }
  0x14   :  { %195 = vperm.xlu0 %2199, %v177_v27  }
  0x15   :  { %2075 = vmatmul.mubr.msk.f32.gmra.mrb[4].mxu1 %vm69_vm0, %v172_v50 }
  0x16   :  { %200 = vperm.xlu1 %2200, %v178_v28   ;;  %2077 = vmatprep.mubr.msk.f32.mxu1 %vm69_vm0, %v173_v51 }
  0x19   :  { %2078 = vmatmul.mubr.msk.f32.gmra.mrb[6].mxu1 %vm69_vm0, %v174_v53 }
  0x87   :  { %v52_v29 = vpop.permute.xlu0 %51  ;;  %v62_v30 = vpop.permute.xlu1 %61 }
  0x8b   :  { %v57_v31 = vpop.permute.xlu0 %56 }
  0x8d   :  { %v67_v32 = vpop.permute.xlu1 %66 }
  0x8f   :  { %v186_v33 = vpop.permute.xlu0 %185 }
  0x91   :  { %v191_v40 = vpop.permute.xlu1 %190 }
  0x93   :  { %v196_v47 = vpop.permute.xlu0 %195 }
  0x95   :  { %v201_v55 = vpop.permute.xlu1 %200 }
  0xdf   :  { %v2056_v34 = vpop.f32.mrb[0].mxu0 }
  0xe0   :  { %v154_v35 = vadd.f32 %v2056_v34, %v57_v31  ;;  %v2070_v36 = vpop.f32.mrb[0].mxu1  ;;  %v148_v37 = vpop.f32.mrb[1].mxu0 }
  0xe1   :  { %v149_v38 = vadd.f32 %v148_v37, %v52_v29  ;;  %v313_v39 = vpop.f32.mrb[1].mxu1  ;;  %v319_v42 = vadd.f32 %v2070_v36, %v191_v40 }
  0xe2   :  { %v314_v41 = vadd.f32 %v313_v39, %v186_v33  ;;  %384 = vxpose.xlu1.b32.start.end [1/1] (short) (narrow) %v154_v35, 32 }
  0xe3   :  { %352 = vxpose.xlu0.b32.start.end [1/1] (short) (narrow) %v149_v38, 32  ;;  %v2059_v43 = vpop.f32.mrb[2].mxu0 }
  0xe4   :  { %v2073_v44 = vpop.f32.mrb[2].mxu1  ;;  %2080 = vmatprep.subr.mxu0 %v314_v41  ;;  %2192 = vmatprep.subr.mxu1 %v314_v41  ;;  %v158_v45 = vpop.f32.mrb[3].mxu0  ;;  %v164_v52 = vadd.f32 %v2059_v43, %v67_v32 }
  0xe5   :  { %v323_v48 = vpop.f32.mrb[3].mxu1  ;;  %2081 = vmatpush3.msra.mxu0 %v314_v41  ;;  %2193 = vmatpush3.msra.mxu1 %v314_v41  ;;  %v159_v54 = vadd.f32 %v158_v45, %v62_v30  ;;  %v329_v60 = vadd.f32 %v2073_v44, %v201_v55 }
  0xe6   :  { %v324_v49 = vadd.f32 %v323_v48, %v196_v47  ;;  %2088 = vmatprep.subr.mxu0 %v319_v42 }
  0xe8   :  { %2096 = vmatprep.subr.mxu1 %v324_v49  ;;  %v2455_v9 = vpop.f32.mrb[4].mxu1 }
  0xe9   :  { %v2457_v10 = vpop.f32.mrb[5].mxu1 }
  0xec   :  { %v2459_v11 = vpop.f32.mrb[6].mxu1 }
  0xed   :  { %v2461_v12 = vpop.f32.mrb[7].mxu1 }
  0xef   :  { %448 = vxpose.xlu1.b32.start.end [1/1] (short) (narrow) %v164_v52, 32 }
  0xf0   :  { %416 = vxpose.xlu0.b32.start.end [1/1] (short) (narrow) %v159_v54, 32 }
 0x162   :  { %v400_v56 = vpop.trf.xlu1 }
 0x163   :  { %v368_v57 = vpop.trf.xlu0 }
 0x164   :  { %2082 = vmatprep.mubr.msk.f32.mxu0 %vm484_vm1, %v368_v57 }
 0x166   :  { %v401_v58 = vpop.trf.xlu1 }
 0x167   :  { %v369_v59 = vpop.trf.xlu0 }
 0x168   :  { %2083 = vmatmul.mubr.msk.f32.vlgmr.msra.gmra.mrb[4].mxu0 %vm484_vm1, %v369_v59 }
 0x169   :  { %2089 = vmatpush3.msra.mxu0 %v319_v42  ;;  %2090 = vmatprep.mubr.msk.f32.mxu0 %vm484_vm1, %v400_v56 }
 0x16a   :  { %2104 = vmatprep.subr.mxu0 %v329_v60  ;;  %v402_v61 = vpop.trf.xlu1 }
 0x16b   :  { %v370_v62 = vpop.trf.xlu0 }
 0x16c   :  { %2091 = vmatmul.mubr.msk.f32.vlgmr.msra.gmra.mrb[6].mxu0 %vm484_vm1, %v401_v58  ;;  %2085 = vmatprep.mubr.msk.f32.mxu1 %vm484_vm1, %v370_v62 }
 0x16d   :  { %2105 = vmatpush3.msra.mxu0 %v329_v60  ;;  %2093 = vmatprep.mubr.msk.f32.mxu0 %vm484_vm1, %v402_v61 }
 0x16e   :  { %v403_v63 = vpop.trf.xlu1 }
 0x16f   :  { %v371_v0 = vpop.trf.xlu0 }
 0x170   :  { %2086 = vmatmul.mubr.msk.f32.vlgmr.msra.gmra.mrb[8].mxu1 %vm484_vm1, %v371_v0  ;;  %2094 = vmatmul.mubr.msk.f32.gmra.mrb[8].mxu0 %vm484_vm1, %v403_v63 }
 0x171   :  { %2097 = vmatpush3.msra.mxu1 %v324_v49 }
 0x172   :  { %v464_v1 = vpop.trf.xlu1 }
 0x173   :  { %v432_v2 = vpop.trf.xlu0  ;;  %2106 = vmatprep.mubr.msk.f32.mxu0 %vm484_vm1, %v464_v1  ;;  %v180_v1 = vld [vmem:[%s2744_s6 + $0x28] sm:$0xff] }
 0x174   :  { %2098 = vmatprep.mubr.msk.f32.mxu1 %vm484_vm1, %v432_v2  ;;  %v179_v2 = vld [vmem:[%s2744_s6 + $0x20] sm:$0xff] }
 0x176   :  { %v465_v3 = vpop.trf.xlu1 }
 0x177   :  { %v433_v4 = vpop.trf.xlu0  ;;  %2107 = vmatmul.mubr.msk.f32.vlgmr.msra.gmra.mrb[10].mxu0 %vm484_vm1, %v465_v3 }
 0x178   :  { %2099 = vmatmul.mubr.msk.f32.vlgmr.msra.gmra.mrb[10].mxu1 %vm484_vm1, %v433_v4 }
 0x17a   :  { %v466_v5 = vpop.trf.xlu1 }
 0x17b   :  { %v434_v6 = vpop.trf.xlu0  ;;  %2109 = vmatprep.mubr.msk.f32.mxu0 %vm484_vm1, %v466_v5 }
 0x17c   :  { %2101 = vmatprep.mubr.msk.f32.mxu1 %vm484_vm1, %v434_v6 }
 0x17e   :  { %v467_v7 = vpop.trf.xlu1 }
 0x17f   :  { %v435_v8 = vpop.trf.xlu0  ;;  %2110 = vmatmul.mubr.msk.f32.gmra.mrb[12].mxu0 %vm484_vm1, %v467_v7 }
 0x180   :  { %2102 = vmatmul.mubr.msk.f32.gmra.mrb[12].mxu1 %vm484_vm1, %v435_v8 }
 0x23b   :  { %v2084_v15 = vpop.f32.mrb[4].mxu0 }
 0x23c   :  { %v2469_v16 = vadd.f32 %v2084_v15, %v481_v13  ;;  %v563_v17 = vpop.f32.mrb[5].mxu0 }
 0x23d   :  { %v2471_v18 = vadd.f32 %v563_v17, %v480_v14 }
 0x23e   :  { %v877_v19 = vsel %vm873_vm2, %v2469_v16, -inf }
 0x23f   :  { %878 = vmax.xlane.f32.xlu1 %v877_v19  ;;  %v2092_v20 = vpop.f32.mrb[6].mxu0  ;;  %v874_v21 = vsel %vm873_vm2, %v2471_v18, -inf }
 0x240   :  { %v2477_v22 = vadd.f32 %v2092_v20, %v481_v13  ;;  %v660_v23 = vpop.f32.mrb[7].mxu0  ;;  %875 = vmax.xlane.f32.xlu0 %v874_v21 }
 0x241   :  { %v2487_v27 = vadd.f32 %v660_v23, %v480_v14 }
 0x242   :  { %v889_v25 = vsel %vm873_vm2, %v2477_v22, -inf }
 0x243   :  { %v2087_v28 = vpop.f32.mrb[8].mxu1  ;;  %v2095_v29 = vpop.f32.mrb[8].mxu0  ;;  %v886_v35 = vsel %vm873_vm2, %v2487_v27, -inf }
 0x244   :  { %890 = vmax.xlane.f32.xlu0 %v889_v25  ;;  %v573_v30 = vpop.f32.mrb[9].mxu1  ;;  %v670_v31 = vpop.f32.mrb[9].mxu0  ;;  %v2489_v32 = vadd.f32 %v2087_v28, %v483_v24  ;;  %v2499_v37 = vadd.f32 %v2095_v29, %v483_v24 }
 0x245   :  { %v2491_v33 = vadd.f32 %v573_v30, %v482_v26  ;;  %v2493_v34 = vadd.f32 %v670_v31, %v482_v26 }
 0x246   :  { %v883_v38 = vsel %vm873_vm2, %v2489_v32, -inf  ;;  %v895_v47 = vsel %vm873_vm2, %v2499_v37, -inf }
 0x247   :  { %v880_v36 = vsel %vm873_vm2, %v2491_v33, -inf  ;;  %v892_v39 = vsel %vm873_vm2, %v2493_v34, -inf }
 0x248   :  { %887 = vmax.xlane.f32.xlu0 %v886_v35  ;;  %881 = vmax.xlane.f32.xlu1 %v880_v36 }
 0x24a   :  { %v2108_v40 = vpop.f32.mrb[10].mxu0 }
 0x24b   :  { %v2100_v41 = vpop.f32.mrb[10].mxu1  ;;  %v854_v42 = vpop.f32.mrb[11].mxu0  ;;  %v2515_v49 = vadd.f32 %v2108_v40, %v481_v13 }
 0x24c   :  { %884 = vmax.xlane.f32.xlu0 %v883_v38  ;;  %893 = vmax.xlane.f32.xlu1 %v892_v39  ;;  %v757_v43 = vpop.f32.mrb[11].mxu1  ;;  %v2505_v44 = vadd.f32 %v2100_v41, %v481_v13  ;;  %v2509_v46 = vadd.f32 %v854_v42, %v480_v14 }
 0x24d   :  { %v2507_v45 = vadd.f32 %v757_v43, %v480_v14  ;;  %v913_v59 = vsel %vm873_vm2, %v2515_v49, -inf }
 0x24e   :  { %v901_v50 = vsel %vm873_vm2, %v2505_v44, -inf  ;;  %v910_v51 = vsel %vm873_vm2, %v2509_v46, -inf }
 0x24f   :  { %v898_v48 = vsel %vm873_vm2, %v2507_v45, -inf }
 0x250   :  { %896 = vmax.xlane.f32.xlu0 %v895_v47  ;;  %899 = vmax.xlane.f32.xlu1 %v898_v48 }
 0x252   :  { %v2111_v52 = vpop.f32.mrb[12].mxu0 }
 0x253   :  { %v2103_v53 = vpop.f32.mrb[12].mxu1  ;;  %v864_v54 = vpop.f32.mrb[13].mxu0  ;;  %v2531_v61 = vadd.f32 %v2111_v52, %v483_v24 }
 0x254   :  { %902 = vmax.xlane.f32.xlu0 %v901_v50  ;;  %911 = vmax.xlane.f32.xlu1 %v910_v51  ;;  %v767_v55 = vpop.f32.mrb[13].mxu1  ;;  %v2521_v56 = vadd.f32 %v2103_v53, %v483_v24  ;;  %v2525_v58 = vadd.f32 %v864_v54, %v482_v26 }
 0x255   :  { %v2523_v57 = vadd.f32 %v767_v55, %v482_v26  ;;  %v919_v0 = vsel %vm873_vm2, %v2531_v61, -inf }
 0x256   :  { %v907_v62 = vsel %vm873_vm2, %v2521_v56, -inf  ;;  %v916_v63 = vsel %vm873_vm2, %v2525_v58, -inf }
 0x257   :  { %v904_v60 = vsel %vm873_vm2, %v2523_v57, -inf }
 0x258   :  { %914 = vmax.xlane.f32.xlu0 %v913_v59  ;;  %905 = vmax.xlane.f32.xlu1 %v904_v60 }
 0x25c   :  { %908 = vmax.xlane.f32.xlu0 %v907_v62  ;;  %917 = vmax.xlane.f32.xlu1 %v916_v63 }
 0x260   :  { %920 = vmax.xlane.f32.xlu0 %v919_v0 }
 0x26d   :  { %210 = vperm.xlu1 %2200, %v180_v1  }
 0x276   :  { %205 = vperm.xlu0 %2199, %v179_v2  }
 0x2cc   :  { %v879_v3 = vpop.xlane.xlu1 %878 }
 0x2cd   :  { %v923_v4 = vsub.f32 %v2469_v16, %v879_v3  ;;  %v876_v5 = vpop.xlane.xlu0 %875 }
 0x2ce   :  { %v922_v6 = vsub.f32 %v2471_v18, %v876_v5 }
 0x2cf   :  { %v940_v7 = vmul.f32 1.442695, %v923_v4 }
 0x2d0   :  { %v938_v8 = vmul.f32 1.442695, %v922_v6 }
 0x2d1   :  { %2201 = vpow2.f32 %v940_v7  ;;  %v891_v13 = vpop.xlane.xlu0 %890 }
 0x2d2   :  { %2203 = vpow2.f32 %v938_v8  ;;  %v927_v14 = vsub.f32 %v2477_v22, %v891_v13 }
 0x2d4   :  { %v948_v15 = vmul.f32 1.442695, %v927_v14 }
 0x2d5   :  { %v882_v17 = vpop.xlane.xlu1 %881  ;;  %v888_v19 = vpop.xlane.xlu0 %887 }
 0x2d6   :  { %2205 = vpow2.f32 %v948_v15  ;;  %v924_v20 = vsub.f32 %v2491_v33, %v882_v17  ;;  %v926_v21 = vsub.f32 %v2487_v27, %v888_v19 }
 0x2d8   :  { %v946_v23 = vmul.f32 1.442695, %v926_v21  ;;  %v942_v16 = vmul.f32 1.442695, %v924_v20 }
 0x2d9   :  { %v894_v24 = vpop.xlane.xlu1 %893  ;;  %v885_v25 = vpop.xlane.xlu0 %884 }
 0x2da   :  { %v928_v18 = vsub.f32 %v2493_v34, %v894_v24  ;;  %v925_v26 = vsub.f32 %v2489_v32, %v885_v25  ;;  %2207 = vpow2.f32 %v946_v23 }
 0x2db   :  { %v2552_v28 = vpop.eup %2201  ;;  %2209 = vpow2.f32 %v942_v16 }
 0x2dc   :  { %v2554_v22 = vpop.eup %2203  ;;  %v944_v29 = vmul.f32 1.442695, %v925_v26  ;;  %v973_v30 = vsel %vm873_vm2, %v2552_v28, 0.0  ;;  %v950_v31 = vmul.f32 1.442695, %v928_v18 }
 0x2dd   :  { %v900_v27 = vpop.xlane.xlu1 %899  ;;  %974 = vadd.xlane.f32.xlu0 %v973_v30  ;;  %v897_v33 = vpop.xlane.xlu0 %896  ;;  %v970_v35 = vsel %vm873_vm2, %v2554_v22, 0.0 }
 0x2de   :  { %v930_v34 = vsub.f32 %v2507_v45, %v900_v27  ;;  %v929_v32 = vsub.f32 %v2499_v37, %v897_v33  ;;  %971 = vadd.xlane.f32.xlu1 %v970_v35  ;;  %2211 = vpow2.f32 %v944_v29  ;;  %v181_v27 = vld [vmem:[%s2744_s6 + $0x30] sm:$0xff]  ;;  %v182_v33 = vld [vmem:[%s2744_s6 + $0x38] sm:$0xff] }
 0x2df   :  { %2213 = vpow2.f32 %v950_v31 }
 0x2e0   :  { %v2562_v36 = vpop.eup %2205  ;;  %v952_v38 = vmul.f32 1.442695, %v929_v32  ;;  %v954_v39 = vmul.f32 1.442695, %v930_v34 }
 0x2e1   :  { %v912_v40 = vpop.xlane.xlu1 %911  ;;  %v903_v41 = vpop.xlane.xlu0 %902  ;;  %v985_v42 = vsel %vm873_vm2, %v2562_v36, 0.0 }
 0x2e2   :  { %v934_v43 = vsub.f32 %v2509_v46, %v912_v40  ;;  %v931_v47 = vsub.f32 %v2505_v44, %v903_v41  ;;  %986 = vadd.xlane.f32.xlu0 %v985_v42  ;;  %2215 = vpow2.f32 %v952_v38 }
 0x2e3   :  { %2217 = vpow2.f32 %v954_v39 }
 0x2e4   :  { %v956_v45 = vmul.f32 1.442695, %v931_v47  ;;  %v2568_v37 = vpop.eup %2207  ;;  %v962_v48 = vmul.f32 1.442695, %v934_v43 }
 0x2e5   :  { %v906_v50 = vpop.xlane.xlu1 %905  ;;  %v915_v51 = vpop.xlane.xlu0 %914  ;;  %v982_v53 = vsel %vm873_vm2, %v2568_v37, 0.0 }
 0x2e6   :  { %v935_v52 = vsub.f32 %v2515_v49, %v915_v51  ;;  %v2573_v54 = vpop.eup %2209  ;;  %2219 = vpow2.f32 %v956_v45  ;;  %983 = vadd.xlane.f32.xlu1 %v982_v53  ;;  %v932_v0 = vsub.f32 %v2523_v57, %v906_v50 }
 0x2e7   :  { %2221 = vpow2.f32 %v962_v48  ;;  %v976_v62 = vsel %vm873_vm2, %v2573_v54, 0.0 }
 0x2e8   :  { %v964_v46 = vmul.f32 1.442695, %v935_v52  ;;  %v2575_v44 = vpop.eup %2211  ;;  %v958_v57 = vmul.f32 1.442695, %v932_v0 }
 0x2e9   :  { %v918_v55 = vpop.xlane.xlu1 %917  ;;  %v909_v59 = vpop.xlane.xlu0 %908  ;;  %v979_v49 = vsel %vm873_vm2, %v2575_v44, 0.0 }
 0x2ea   :  { %v933_v60 = vsub.f32 %v2521_v56, %v909_v59  ;;  %v2582_v63 = vpop.eup %2213  ;;  %2223 = vpow2.f32 %v964_v46  ;;  %977 = vadd.xlane.f32.xlu1 %v976_v62  ;;  %980 = vadd.xlane.f32.xlu0 %v979_v49  ;;  %v936_v13 = vsub.f32 %v2525_v58, %v918_v55 }
 0x2eb   :  { %v988_v6 = vsel %vm873_vm2, %v2582_v63, 0.0 }
 0x2ec   :  { %v960_v1 = vmul.f32 1.442695, %v933_v60  ;;  %v2585_v2 = vpop.eup %2215  ;;  %v966_v58 = vmul.f32 1.442695, %v936_v13 }
 0x2ed   :  { %v211_v3 = vpop.permute.xlu1 %210  ;;  %v921_v4 = vpop.xlane.xlu0 %920  ;;  %v991_v7 = vsel %vm873_vm2, %v2585_v2, 0.0 }
 0x2ee   :  { %v339_v56 = vadd.f32 %v2455_v9, %v211_v3  ;;  %v937_v5 = vsub.f32 %v2531_v61, %v921_v4  ;;  %v2593_v8 = vpop.eup %2217  ;;  %2225 = vpow2.f32 %v960_v1  ;;  %989 = vadd.xlane.f32.xlu1 %v988_v6  ;;  %992 = vadd.xlane.f32.xlu0 %v991_v7 }
 0x2ef   :  { %v994_v61 = vsel %vm873_vm2, %v2593_v8, 0.0 }
 0x2f0   :  { %v968_v14 = vmul.f32 1.442695, %v937_v5  ;;  %2120 = vmatprep.subr.msk.mxu0 %vm873_vm2, %v339_v56  ;;  %v2597_v9 = vpop.eup %2219 }
 0x2f1   :  { %2121 = vmatpush3.xpose.msk.msra.mxu0 %vm873_vm2, %v339_v56  ;;  %v997_v15 = vsel %vm873_vm2, %v2597_v9, 0.0  ;;  %v2604_v17 = vpop.eup %2221 }
 0x2f2   :  { %2227 = vpow2.f32 %v968_v14  ;;  %995 = vadd.xlane.f32.xlu1 %v994_v61  ;;  %998 = vadd.xlane.f32.xlu0 %v997_v15  ;;  %v1006_v23 = vsel %vm873_vm2, %v2604_v17, 0.0 }
 0x2f3   :  { %2229 = vpow2.f32 %v958_v57 }
 0x2f4   :  { %v2606_v19 = vpop.eup %2223  ;;  %2231 = vpow2.f32 %v966_v58 }
 0x2f5   :  { %v206_v20 = vpop.permute.xlu0 %205  ;;  %v1009_v16 = vsel %vm873_vm2, %v2606_v19, 0.0 }
 0x2f6   :  { %v334_v21 = vadd.f32 %v2457_v10, %v206_v20  ;;  %1007 = vadd.xlane.f32.xlu1 %v1006_v23  ;;  %1010 = vadd.xlane.f32.xlu0 %v1009_v16  ;;  %v1451_v16 = vld [vmem:[%s2745_s7 + $0x8] sm:$0xff] }
 0x2f8   :  { %2112 = vmatprep.subr.msk.mxu1 %vm873_vm2, %v334_v21  ;;  %v2614_v24 = vpop.eup %2225 }
 0x2f9   :  { %2113 = vmatpush3.xpose.msk.msra.mxu1 %vm873_vm2, %v334_v21  ;;  %v1003_v25 = vsel %vm873_vm2, %v2614_v24, 0.0 }
 0x2fa   :  { %1004 = vadd.xlane.f32.xlu0 %v1003_v25  ;;  %v1453_v25 = vld [vmem:[%s2745_s7 + $0x18] sm:$0xff] }
 0x2fc   :  { %v2619_v10 = vpop.eup %2227 }
 0x2fd   :  { %v1015_v18 = vsel %vm873_vm2, %v2619_v10, 0.0  ;;  %v2623_v26 = vpop.eup %2229 }
 0x2fe   :  { %1016 = vadd.xlane.f32.xlu1 %v1015_v18  ;;  %v1000_v29 = vsel %vm873_vm2, %v2623_v26, 0.0  ;;  %v2627_v30 = vpop.eup %2231 }
 0x2ff   :  { %v1012_v31 = vsel %vm873_vm2, %v2627_v30, 0.0 }
 0x302   :  { %1001 = vadd.xlane.f32.xlu1 %v1000_v29 }
 0x306   :  { %1013 = vadd.xlane.f32.xlu1 %v1012_v31 }
 0x310   :  { %215 = vperm.xlu0 %2199, %v181_v27  }
 0x317   :  { %220 = vperm.xlu1 %2200, %v182_v33  }
 0x36a   :  { %v975_v35 = vpop.xlane.xlu0 %974 }
 0x36b   :  { %2233 = vrcp.f32 %v975_v35  ;;  %v972_v34 = vpop.xlane.xlu1 %971 }
 0x36c   :  { %2235 = vrcp.f32 %v972_v34 }
 0x36f   :  { %v987_v32 = vpop.xlane.xlu0 %986 }
 0x370   :  { %2237 = vrcp.f32 %v987_v32 }
 0x373   :  { %v984_v38 = vpop.xlane.xlu1 %983 }
 0x374   :  { %2239 = vrcp.f32 %v984_v38 }
 0x375   :  { %v2234_v39 = vpop.eup %2233 }
 0x376   :  { %v2236_v40 = vpop.eup %2235  ;;  %v1021_v42 = vmul.f32 %v2234_v39, %v2552_v28 }
 0x377   :  { %v1019_v41 = vmul.f32 %v2236_v40, %v2554_v22  ;;  %v978_v43 = vpop.xlane.xlu1 %977  ;;  %v981_v47 = vpop.xlane.xlu0 %980 }
 0x378   :  { %2241 = vrcp.f32 %v978_v43 }
 0x379   :  { %2114 = vmatprep.mubr.msk.f32.mxu1 %vm873_vm2, %v1019_v41  ;;  %2243 = vrcp.f32 %v981_v47 }
 0x37a   :  { %2115 = vmatmul.mubr.msk.f32.vlgmr.msra.gmra.mrb[14].mxu1 %vm873_vm2, %v1021_v42  ;;  %v2238_v50 = vpop.eup %2237 }
 0x37b   :  { %v990_v45 = vpop.xlane.xlu1 %989  ;;  %v993_v48 = vpop.xlane.xlu0 %992  ;;  %v1029_v28 = vmul.f32 %v2238_v50, %v2562_v36 }
 0x37c   :  { %2245 = vrcp.f32 %v990_v45 }
 0x37d   :  { %2247 = vrcp.f32 %v993_v48 }
 0x37e   :  { %v2240_v51 = vpop.eup %2239 }
 0x37f   :  { %v996_v52 = vpop.xlane.xlu1 %995  ;;  %v999_v53 = vpop.xlane.xlu0 %998  ;;  %v1027_v22 = vmul.f32 %v2240_v51, %v2568_v37 }
 0x380   :  { %2249 = vrcp.f32 %v996_v52 }
 0x381   :  { %2122 = vmatprep.mubr.msk.f32.mxu0 %vm873_vm2, %v1027_v22 }
 0x382   :  { %v2242_v46 = vpop.eup %2241  ;;  %2123 = vmatmul.mubr.msk.f32.vlgmr.msra.gmra.mrb[14].mxu0 %vm873_vm2, %v1029_v28 }
 0x383   :  { %v2244_v55 = vpop.eup %2243  ;;  %v1008_v59 = vpop.xlane.xlu1 %1007  ;;  %v1023_v60 = vmul.f32 %v2242_v46, %v2573_v54 }
 0x384   :  { %2251 = vrcp.f32 %v1008_v59  ;;  %v1025_v62 = vmul.f32 %v2244_v55, %v2575_v44  ;;  %v1011_v49 = vpop.xlane.xlu0 %1010 }
 0x385   :  { %2117 = vmatprep.mubr.msk.f32.mxu1 %vm873_vm2, %v1023_v60  ;;  %2253 = vrcp.f32 %v999_v53 }
 0x386   :  { %v2246_v0 = vpop.eup %2245  ;;  %2118 = vmatmul.mubr.msk.f32.gmra.mrb[16].mxu1 %vm873_vm2, %v1025_v62  ;;  %2255 = vrcp.f32 %v1011_v49 }
 0x387   :  { %v2248_v36 = vpop.eup %2247  ;;  %v1031_v37 = vmul.f32 %v2246_v0, %v2582_v63 }
 0x388   :  { %v1033_v1 = vmul.f32 %v2248_v36, %v2585_v2  ;;  %v1005_v4 = vpop.xlane.xlu0 %1004 }
 0x389   :  { %2125 = vmatprep.mubr.msk.f32.mxu0 %vm873_vm2, %v1031_v37  ;;  %2257 = vrcp.f32 %v1005_v4 }
 0x38a   :  { %v2250_v3 = vpop.eup %2249  ;;  %2126 = vmatmul.mubr.msk.f32.gmra.mrb[16].mxu0 %vm873_vm2, %v1033_v1 }
 0x38b   :  { %v1017_v54 = vpop.xlane.xlu1 %1016  ;;  %v1035_v44 = vmul.f32 %v2250_v3, %v2593_v8 }
 0x38d   :  { %2130 = vmatprep.mubr.msk.f32.mxu1 %vm873_vm2, %v1035_v44 }
 0x38e   :  { %v2252_v56 = vpop.eup %2251 }
 0x38f   :  { %v1002_v5 = vpop.xlane.xlu1 %1001  ;;  %v216_v6 = vpop.permute.xlu0 %215  ;;  %v1043_v63 = vmul.f32 %v2252_v56, %v2604_v17 }
 0x390   :  { %2259 = vrcp.f32 %v1002_v5  ;;  %v344_v2 = vadd.f32 %v2461_v12, %v216_v6  ;;  %v2254_v7 = vpop.eup %2253 }
 0x391   :  { %2138 = vmatprep.mubr.msk.f32.mxu0 %vm873_vm2, %v1043_v63  ;;  %2261 = vrcp.f32 %v1017_v54  ;;  %v1037_v8 = vmul.f32 %v2254_v7, %v2597_v9  ;;  %v2256_v14 = vpop.eup %2255 }
 0x392   :  { %2128 = vmatprep.subr.msk.mxu1 %vm873_vm2, %v344_v2  ;;  %v1045_v58 = vmul.f32 %v2256_v14, %v2606_v19  ;;  %v1450_v19 = vld [vmem:[%s2745_s7] sm:$0xff] }
 0x393   :  { %v1014_v57 = vpop.xlane.xlu1 %1013  ;;  %2129 = vmatpush3.xpose.msk.msra.mxu1 %vm873_vm2, %v344_v2  ;;  %v2258_v15 = vpop.eup %2257 }
 0x394   :  { %2263 = vrcp.f32 %v1014_v57  ;;  %v1041_v20 = vmul.f32 %v2258_v15, %v2614_v24  ;;  %2144 = vmatprep.subr.mxu1 %v1450_v19  ;;  %v1452_v24 = vld [vmem:[%s2745_s7 + $0x10] sm:$0xff]  ;;  %v1965_v57 = vld [vmem:[%s2746_s8] ss:$0 sm:$0xff]  ;;  %s2290_s8 = smov [#allocation2]  }
 0x395   :  { %s1890_s14 = sshll.u32 %s2290_s8, 4  ;;  %s1891_s14 = int_to_ptr.vmem [resolvable:$true] %s1890_s14 }
 0x396   :  { %2131 = vmatmul.mubr.msk.f32.vlgmr.msra.gmra.mrb[18].mxu1 %vm873_vm2, %v1037_v8  ;;  %s2265_s15 = scalar_lea.vmem %s1891_s14, 512  ;;  %p2270_p1 = scmp.lt.s32.totalorder %s1891_s14, %s1891_s14 }
 0x397   :  { %v221_v13 = vpop.permute.xlu1 %220  ;;  %2145 = vmatpush3.msra.mxu1 %v1450_v19  ;;  %p2266_p0 = scmp.ne.s32.totalorder %s1891_s14, %s2265_s15  ;;  %p2271_p2 = scmp.lt.s32.totalorder %s2265_s15, %s2265_s15 }
 0x398   :  { %v349_v61 = vadd.f32 %v2459_v11, %v221_v13  ;;  %2160 = vmatprep.subr.mxu1 %v1452_v24 }
 0x399   :  { %p2272_p3 = por %p2271_p2, %p2270_p1 }
 0x39a   :  { %v2260_v12 = vpop.eup %2259  ;;  %2136 = vmatprep.subr.msk.mxu0 %vm873_vm2, %v349_v61 }
 0x39b   :  { %2137 = vmatpush3.xpose.msk.msra.mxu0 %vm873_vm2, %v349_v61  ;;  %v1039_v17 = vmul.f32 %v2260_v12, %v2623_v26  ;;  %v2262_v21 = vpop.eup %2261  ;;  %p2273_p4 = pnand %p2272_p3, %p2266_p0 }
 0x39c   :  { %v1049_v23 = vmul.f32 %v2262_v21, %v2619_v10  ;;  %2152 = vmatprep.subr.mxu0 %v1451_v16 }
 0x39d   :  { %2133 = vmatprep.mubr.msk.f32.mxu1 %vm873_vm2, %v1039_v17 }
 0x39e   :  { %v2264_v9 = vpop.eup %2263  ;;  %2134 = vmatmul.mubr.msk.f32.gmra.mrb[20].mxu1 %vm873_vm2, %v1041_v20  ;;  %2139 = vmatmul.mubr.msk.f32.vlgmr.msra.gmra.mrb[18].mxu0 %vm873_vm2, %v1045_v58 }
 0x39f   :  { %v1047_v11 = vmul.f32 %v2264_v9, %v2627_v30  ;;  %2153 = vmatpush3.msra.mxu0 %v1451_v16 }
 0x3a0   :  { %2168 = vmatprep.subr.mxu0 %v1453_v25 }
 0x3a1   :  { %2141 = vmatprep.mubr.msk.f32.mxu0 %vm873_vm2, %v1047_v11 }
 0x3a2   :  { %2142 = vmatmul.mubr.msk.f32.gmra.mrb[20].mxu0 %vm873_vm2, %v1049_v23 }
 0x44d   :  { %v2116_v10 = vpop.f32.mrb[14].mxu1 }
 0x44e   :  { %v1131_v18 = vpop.f32.mrb[15].mxu1 }
 0x44f   :  { %2146 = vmatprep.mubr.msk.f32.mxu1 %vm484_vm1, %v1131_v18 }
 0x450   :  { %2147 = vmatmul.mubr.msk.f32.vlgmr.msra.gmra.mrb[22].mxu1 %vm484_vm1, %v2116_v10 }
 0x451   :  { %2161 = vmatpush3.msra.mxu1 %v1452_v24 }
 0x455   :  { %v2124_v26 = vpop.f32.mrb[14].mxu0 }
 0x456   :  { %v1231_v29 = vpop.f32.mrb[15].mxu0 }
 0x457   :  { %2154 = vmatprep.mubr.msk.f32.mxu0 %vm484_vm1, %v1231_v29 }
 0x458   :  { %2155 = vmatmul.mubr.msk.f32.vlgmr.msra.gmra.mrb[22].mxu0 %vm484_vm1, %v2124_v26 }
 0x459   :  { %v2119_v30 = vpop.f32.mrb[16].mxu1  ;;  %2169 = vmatpush3.msra.mxu0 %v1453_v25 }
 0x45a   :  { %v1141_v31 = vpop.f32.mrb[17].mxu1 }
 0x45b   :  { %2149 = vmatprep.mubr.msk.f32.mxu1 %vm484_vm1, %v1141_v31 }
 0x45c   :  { %2150 = vmatmul.mubr.msk.f32.gmra.mrb[24].mxu1 %vm484_vm1, %v2119_v30 }
 0x45d   :  { %v2127_v27 = vpop.f32.mrb[16].mxu0 }
 0x45e   :  { %v1241_v33 = vpop.f32.mrb[17].mxu0 }
 0x45f   :  { %2157 = vmatprep.mubr.msk.f32.mxu0 %vm484_vm1, %v1241_v33 }
 0x460   :  { %2158 = vmatmul.mubr.msk.f32.gmra.mrb[24].mxu0 %vm484_vm1, %v2127_v27 }
 0x469   :  { %v2132_v35 = vpop.f32.mrb[18].mxu1 }
 0x46a   :  { %v1331_v34 = vpop.f32.mrb[19].mxu1 }
 0x46b   :  { %2162 = vmatprep.mubr.msk.f32.mxu1 %vm484_vm1, %v1331_v34 }
 0x46c   :  { %2163 = vmatmul.mubr.msk.f32.vlgmr.msra.gmra.mrb[26].mxu1 %vm484_vm1, %v2132_v35 }
 0x471   :  { %v2135_v32 = vpop.f32.mrb[20].mxu1  ;;  %v2140_v38 = vpop.f32.mrb[18].mxu0 }
 0x472   :  { %v1341_v39 = vpop.f32.mrb[21].mxu1  ;;  %v1431_v40 = vpop.f32.mrb[19].mxu0 }
 0x473   :  { %2165 = vmatprep.mubr.msk.f32.mxu1 %vm484_vm1, %v1341_v39  ;;  %2170 = vmatprep.mubr.msk.f32.mxu0 %vm484_vm1, %v1431_v40 }
 0x474   :  { %2166 = vmatmul.mubr.msk.f32.gmra.mrb[28].mxu1 %vm484_vm1, %v2135_v32  ;;  %2171 = vmatmul.mubr.msk.f32.vlgmr.msra.gmra.mrb[26].mxu0 %vm484_vm1, %v2140_v38 }
 0x475   :  { %v2143_v41 = vpop.f32.mrb[20].mxu0 }
 0x476   :  { %v1441_v42 = vpop.f32.mrb[21].mxu0 }
 0x477   :  { %2173 = vmatprep.mubr.msk.f32.mxu0 %vm484_vm1, %v1441_v42 }
 0x478   :  { %2174 = vmatmul.mubr.msk.f32.gmra.mrb[28].mxu0 %vm484_vm1, %v2143_v41 }
 0x523   :  { %v2148_v43 = vpop.f32.mrb[22].mxu1 }
 0x524   :  { %v1532_v47 = vpop.f32.mrb[23].mxu1  ;;  %v1849_v48 = vsel %vm69_vm0, %v2148_v43, 0.0 }
 0x525   :  { %v1842_v52 = vsel %vm69_vm0, %v1532_v47, 0.0 }
 0x52b   :  { %v2156_v45 = vpop.f32.mrb[22].mxu0 }
 0x52c   :  { %v1850_v50 = vsel %vm69_vm0, %v2156_v45, 0.0  ;;  %v1629_v51 = vpop.f32.mrb[23].mxu0 }
 0x52d   :  { %v1851_v53 = vadd.f32 %v1850_v50, %v1849_v48  ;;  %v1843_v22 = vsel %vm69_vm0, %v1629_v51, 0.0 }
 0x52e   :  { %v1844_v28 = vadd.f32 %v1843_v22, %v1842_v52 }
 0x52f   :  { %v2151_v46 = vpop.f32.mrb[24].mxu1 }
 0x530   :  { %v1542_v55 = vpop.f32.mrb[25].mxu1  ;;  %v1863_v60 = vsel %vm69_vm0, %v2151_v46, 0.0 }
 0x531   :  { %v1856_v0 = vsel %vm69_vm0, %v1542_v55, 0.0 }
 0x533   :  { %v2159_v59 = vpop.f32.mrb[24].mxu0 }
 0x534   :  { %v1864_v62 = vsel %vm69_vm0, %v2159_v59, 0.0  ;;  %v1639_v49 = vpop.f32.mrb[25].mxu0 }
 0x535   :  { %v1865_v36 = vadd.f32 %v1864_v62, %v1863_v60  ;;  %v1857_v37 = vsel %vm69_vm0, %v1639_v49, 0.0 }
 0x536   :  { %v1858_v1 = vadd.f32 %v1857_v37, %v1856_v0 }
 0x53f   :  { %v2164_v3 = vpop.f32.mrb[26].mxu1 }
 0x540   :  { %v1852_v54 = vsel %vm69_vm0, %v2164_v3, 0.0  ;;  %v1726_v4 = vpop.f32.mrb[27].mxu1 }
 0x541   :  { %v1853_v44 = vadd.f32 %v1852_v54, %v1851_v53  ;;  %v1845_v56 = vsel %vm69_vm0, %v1726_v4, 0.0 }
 0x542   :  { %v1846_v5 = vadd.f32 %v1845_v56, %v1844_v28 }
 0x547   :  { %v2167_v6 = vpop.f32.mrb[28].mxu1  ;;  %v2172_v63 = vpop.f32.mrb[26].mxu0 }
 0x548   :  { %v1866_v2 = vsel %vm69_vm0, %v2167_v6, 0.0  ;;  %v1854_v7 = vsel %vm69_vm0, %v2172_v63, 0.0  ;;  %v1736_v8 = vpop.f32.mrb[29].mxu1  ;;  %v1823_v13 = vpop.f32.mrb[27].mxu0 }
 0x549   :  { %v1867_v14 = vadd.f32 %v1866_v2, %v1865_v36  ;;  %v1855_v61 = vadd.f32 %v1854_v7, %v1853_v44  ;;  %v1859_v15 = vsel %vm69_vm0, %v1736_v8, 0.0  ;;  %v1847_v12 = vsel %vm69_vm0, %v1823_v13, 0.0 }
 0x54a   :  { %v1860_v17 = vadd.f32 %v1859_v15, %v1858_v1  ;;  %v1848_v58 = vadd.f32 %v1847_v12, %v1846_v5 }
 0x54b   :  { %v1878_v20 = vadd.f32 %v1965_v57, %v1855_v61  ;;  %v2175_v21 = vpop.f32.mrb[28].mxu0 }
 0x54c   :  { %v1877_v9 = vadd.f32 %v1965_v57, %v1848_v58  ;;  %v1868_v11 = vsel %vm69_vm0, %v2175_v21, 0.0  ;;  %v1833_v23 = vpop.f32.mrb[29].mxu0 }
 0x54d   :  { %1882 = vst.msk [vmem:[#allocation2 + $0x8] sm:$0xff] %vm69_vm0, %v1878_v20  ;;  %v1869_v19 = vadd.f32 %v1868_v11, %v1867_v14  ;;  %v1861_v16 = vsel %vm69_vm0, %v1833_v23, 0.0 }
 0x54e   :  { %1881 = vst.msk [vmem:[#allocation2] sm:$0xff] %vm69_vm0, %v1877_v9  ;;  %v1862_v24 = vadd.f32 %v1861_v16, %v1860_v17 }
 0x54f   :  { %v1880_v25 = vadd.f32 %v1965_v57, %v1869_v19 }
 0x550   :  { %v1879_v10 = vadd.f32 %v1965_v57, %v1862_v24 }
 0x551   :  { %1884 = vst.msk [vmem:[#allocation2 + $0x18] sm:$0xff] %vm69_vm0, %v1880_v25 }
 0x552   :  { %1883 = vst.msk [vmem:[#allocation2 + $0x10] sm:$0xff] %vm69_vm0, %v1879_v10 }
 0x553   :  { %2276 = shalt.err (!%p2273_p4)
}
 0x554   :  { %s2277_s17 = scalar_lea.hbm %s2747_s9, 512 }
 0x555   :  { %p2278_p5 = scmp.ne.s32.totalorder %s2747_s9, %s2277_s17  ;;  %p2281_p6 = scmp.lt.u32.totalorder %s2277_s17, %s2747_s9 }
 0x557   :  { %p2283_p7 = pnand %p2281_p6, %p2278_p5 }
 0x559   :  { %2286 = shalt.err (!%p2283_p7)
}
 0x55a   :  { %s2291_s22 = smov 128   ;;  %s2292_s23 = smov 8  }
 0x55b   :  { %1896 = dma.vmem_to_hbm [thread:$0]  %s1891_s14, 512, %s2747_s9, [#allocation3], %s2291_s22, %s2291_s22, %s2292_s23  }
 0x55c   :  { %2287 = dma.done.wait [#allocation3], 512  }
 0x55d   :  { %2288 = vsyncadd [#allocation3], 4294966784 }
 0x55e   :  { %1900 = vsyncpa [#allocation3], 1 }

</bundles_post_ra>
